<compile_context>
chip_gen: v7x
topology: tpu7x:2x2x1
jax: 0.10.0
libtpu: 0.0.40
codegen_flags: <defaults>
</compile_context>

<pallas_src>
import functools

import numpy as np
import jax
import jax.numpy as jnp
from jax import lax
from jax.experimental import pallas as pl
from jax.experimental.pallas import tpu as pltpu


def _difformer_kernel(xq_ref, xs_ref, w_ref, b_ref, kvmask_ref, pool_ref, out_ref,
                      *, num_heads, out_channels, n_tokens, l_tokens, b_blk):
    H, M = num_heads, out_channels
    HM = H * M
    N, L = n_tokens, l_tokens

    w_q = w_ref[0]            # [C_in, 2*HM]  (v-half columns are zero)
    w_kv = w_ref[1]           # [C_in, 2*HM]  ([Wk | Wv])
    b_q = b_ref[0]            # [1, 2*HM]
    b_kv = b_ref[1]           # [1, 2*HM]
    kv_mask = kvmask_ref[...]  # [2*HM, 2*HM] same-head selector: k-rows -> v-cols
    pool = pool_ref[...]       # [2*HM, OUT_PAD] head-mean pooling (only v-half rows nonzero)

    # Stacked projections over every token of every problem in this block:
    # one matmul per side (K and V fused), f32 MXU accumulation.
    q_all = jnp.dot(xq_ref[...], w_q, preferred_element_type=jnp.float32) + b_q     # [B_blk*N, 2HM]
    kv_all = jnp.dot(xs_ref[...], w_kv, preferred_element_type=jnp.float32) + b_kv  # [B_blk*L, 2HM]

    # Lane mask selecting the k-half columns (only used for the ||k|| reduction).
    col = lax.broadcasted_iota(jnp.int32, (1, 2 * HM), 1)
    k_half = (col < HM).astype(jnp.float32)

    for bb in range(b_blk):    # small block, unrolled at trace time
        q = q_all[bb * N:(bb + 1) * N, :]       # [N, 2HM] (v-half columns are zero)
        kvc = kv_all[bb * L:(bb + 1) * L, :]    # [L, 2HM] = [k | v]

        # Global Frobenius norms folded into ONE scalar; applied post-matmul so the
        # XLU reductions overlap the MXU chain below (no XLU->MXU stall).
        s = lax.rsqrt(jnp.sum(q * q) * jnp.sum(kvc * kvc * k_half))

        # Per-head k^T v for all heads at once: one [2HM,2HM] matmul + block mask.
        # TODO(synk): for HM >~ 256 this masked-dense formulation wastes H x MXU work;
        # switch to per-head contractions at that scale.
        kvkv = lax.dot_general(kvc, kvc, (((0,), (0,)), ((), ())),
                               preferred_element_type=jnp.float32)        # [2HM, 2HM]
        kv_ext = kvkv * kv_mask

        colsum = jnp.sum(kvc, axis=0, keepdims=True)                      # [1,2HM] = [ks_sum | vs_sum]

        # Numerator and per-head normalizer, both at full 2HM lane width.
        # (k-half columns hold harmless finite garbage; the pooling matmul zeroes them.)
        num = jnp.dot(q, kv_ext, preferred_element_type=jnp.float32) * s + colsum   # [N, 2HM]
        norm = (jnp.dot(q * colsum, kv_mask, preferred_element_type=jnp.float32) * s
                + jnp.float32(N))                                                   # [N, 2HM]

        # EUP approximate reciprocal + one Newton step (normalizer ~ N, well away from 0).
        r = pl.reciprocal(norm, approx=True)
        r = r * (2.0 - norm * r)

        # Head-mean pooling straight into a lane-dense [N, OUT_PAD] slab (unmasked vst).
        out = jnp.dot(num * r, pool, preferred_element_type=jnp.float32)
        out_ref[pl.ds(bb * N, N), :] = out.astype(out_ref.dtype)


def difformer_conv_batched(query_input, source_input, params, *,
                           num_heads, out_channels, num_batch_blocks=None):
    """query_input: [B, N, C_in], source_input: [B, L, C_in].
    params: wq/wk/wv as [C_in, H*M] (pre-transposed), bq/bk/bv as [1, H*M]."""
    B, N, C_in = query_input.shape
    _, L, _ = source_input.shape
    H, M = num_heads, out_channels
    HM = H * M
    out_pad = ((M + 127) // 128) * 128      # lane-dense output width (multiple of 128)

    if num_batch_blocks is None:
        # Two grid steps let a v7x megacore shard the batch across its 2 TensorCores.
        # On single-TC chips (v5e/v6e) pass num_batch_blocks=1 (each extra grid step is
        # ~0.35 us of pure overhead at these shapes).
        ok2 = (B % 2 == 0) and ((B // 2) * N) % 8 == 0 and ((B // 2) * L) % 8 == 0
        num_batch_blocks = 2 if (B >= 2 and ok2) else 1
    assert B % num_batch_blocks == 0
    b_blk = B // num_batch_blocks

    f32 = jnp.float32
    zeros_w = jnp.zeros((C_in, HM), f32)
    zeros_b = jnp.zeros((1, HM), f32)
    # slot 0: Wq zero-padded to width 2*HM; slot 1: fused [Wk | Wv].
    w_packed = jnp.stack(
        [jnp.concatenate([params["wq"].astype(f32), zeros_w], axis=1),
         jnp.concatenate([params["wk"].astype(f32), params["wv"].astype(f32)], axis=1)],
        axis=0)                                                           # [2, C_in, 2*HM]
    b_packed = jnp.stack(
        [jnp.concatenate([params["bq"].astype(f32), zeros_b], axis=1),
         jnp.concatenate([params["bk"].astype(f32), params["bv"].astype(f32)], axis=1)],
        axis=0)                                                           # [2, 1, 2*HM]

    # Constant selector matrices, built once on the host (hoisted out of the kernel).
    idx = np.arange(2 * HM)
    kv_mask = ((idx[:, None] < HM) & (idx[None, :] >= HM)
               & ((idx[:, None] // M) == ((idx[None, :] - HM) // M))).astype(np.float32)
    pool = np.zeros((2 * HM, out_pad), np.float32)
    vrows = np.arange(HM, 2 * HM)
    pool[vrows, (vrows - HM) % M] = 1.0 / H

    xq2d = query_input.reshape(B * N, C_in).astype(f32)
    xs2d = source_input.reshape(B * L, C_in).astype(f32)

    kernel = functools.partial(_difformer_kernel, num_heads=H, out_channels=M,
                               n_tokens=N, l_tokens=L, b_blk=b_blk)
    shared2 = lambda i: (0, 0)
    shared3 = lambda i: (0, 0, 0)

    out = pl.pallas_call(
        kernel,
        out_shape=jax.ShapeDtypeStruct((B * N, out_pad), jnp.float32),
        grid_spec=pltpu.PrefetchScalarGridSpec(
            num_scalar_prefetch=0,
            grid=(num_batch_blocks,),
            in_specs=[
                pl.BlockSpec((b_blk * N, C_in), lambda i: (i, 0)),   # stacked query tokens
                pl.BlockSpec((b_blk * L, C_in), lambda i: (i, 0)),   # stacked source tokens
                pl.BlockSpec((2, C_in, 2 * HM), shared3),            # packed weights (resident)
                pl.BlockSpec((2, 1, 2 * HM), shared3),               # packed biases (resident)
                pl.BlockSpec((2 * HM, 2 * HM), shared2),             # same-head block mask
                pl.BlockSpec((2 * HM, out_pad), shared2),            # head-mean pooling matrix
            ],
            out_specs=pl.BlockSpec((b_blk * N, out_pad), lambda i: (i, 0)),
        ),
        compiler_params=pltpu.CompilerParams(
            dimension_semantics=("parallel",)),   # megacore-shard the batch blocks
    )(xq2d, xs2d, w_packed, b_packed, jnp.asarray(kv_mask), jnp.asarray(pool))

    # Layout plumbing back to the module's [B, N, M] (wrapper-side slice/reshape is free).
    return out[:, :M].reshape(B, N, M)


def difformer_conv(query_input, source_input, params, *, num_heads, out_channels):
    """Single-problem interface matching the PyTorch module ([N,C_in], [L,C_in])."""
    out = difformer_conv_batched(query_input[None], source_input[None], params,
                                 num_heads=num_heads, out_channels=out_channels)
    return out[0]


def difformer_reference(query_input, source_input, params, *, num_heads, out_channels):
    """Pure-JAX reference mirroring the PyTorch code (kernel='simple')."""
    H, M = num_heads, out_channels
    q = (query_input @ params["wq"] + params["bq"]).reshape(-1, H, M)
    k = (source_input @ params["wk"] + params["bk"]).reshape(-1, H, M)
    v = (source_input @ params["wv"] + params["bv"]).reshape(-1, H, M)
    N = q.shape[0]
    q = q / jnp.linalg.norm(q.reshape(-1))
    k = k / jnp.linalg.norm(k.reshape(-1))
    kvs = jnp.einsum('lhm,lhd->hmd', k, v)
    num = jnp.einsum('nhm,hmd->nhd', q, kvs)
    num = num + jnp.sum(v, axis=0)[None]
    ks_sum = jnp.sum(k, axis=0)
    normalizer = jnp.einsum('nhm,hm->nh', q, ks_sum)[..., None] + N
    attn_out = num / normalizer
    return attn_out.mean(axis=1)


if __name__ == "__main__":
    # Small shapes consistent with the module:
    #   B = 4 independent problems, N = L = 16 tokens/nodes,
    #   in_channels = 32, out_channels = 8, heads = 4
    B = 4
    N = L = 16
    C_IN = 32
    OUT_C = 8
    HEADS = 4
    HM = OUT_C * HEADS

    key = jax.random.PRNGKey(0)
    k_xq, k_xs, k_wq, k_bq, k_wk, k_bk, k_wv, k_bv = jax.random.split(key, 8)

    xq = jax.random.normal(k_xq, (B, N, C_IN), dtype=jnp.float32)
    xs = jax.random.normal(k_xs, (B, L, C_IN), dtype=jnp.float32)

    # nn.Linear(in_channels, out_channels*num_heads) init: U(-1/sqrt(in), 1/sqrt(in)).
    bound = 1.0 / (C_IN ** 0.5)
    params = {
        "wq": jax.random.uniform(k_wq, (C_IN, HM), jnp.float32, -bound, bound),
        "bq": jax.random.uniform(k_bq, (1, HM), jnp.float32, -bound, bound),
        "wk": jax.random.uniform(k_wk, (C_IN, HM), jnp.float32, -bound, bound),
        "bk": jax.random.uniform(k_bk, (1, HM), jnp.float32, -bound, bound),
        "wv": jax.random.uniform(k_wv, (C_IN, HM), jnp.float32, -bound, bound),
        "bv": jax.random.uniform(k_bv, (1, HM), jnp.float32, -bound, bound),
    }

    # Batched call: one pallas_call, 2 grid steps over batch halves (parallel semantics).
    out = difformer_conv_batched(xq, xs, params, num_heads=HEADS, out_channels=OUT_C)
    out = jax.block_until_ready(out)
    assert out.shape == (B, N, OUT_C)

    for b in range(B):
        ref_b = difformer_reference(xq[b], xs[b], params,
                                    num_heads=HEADS, out_channels=OUT_C)
        err = float(jnp.max(jnp.abs(out[b] - ref_b)))
        assert jnp.allclose(out[b], ref_b, atol=5e-5, rtol=5e-5), \
            f"batch {b}: max abs err = {err}"

    # Single-problem (module-shaped) interface.
    out0 = difformer_conv(xq[0], xs[0], params, num_heads=HEADS, out_channels=OUT_C)
    out0 = jax.block_until_ready(out0)
    ref0 = difformer_reference(xq[0], xs[0], params,
                               num_heads=HEADS, out_channels=OUT_C)
    assert out0.shape == (N, OUT_C)
    assert jnp.allclose(out0, ref0, atol=5e-5, rtol=5e-5), \
        f"max abs err = {float(jnp.max(jnp.abs(out0 - ref0)))}"

    print("KERNEL_OK")
</pallas_src>

<mosaic_0001>
module attributes {stable_mosaic.version = 11 : i64} {
  func.func @_difformer_kernel(%arg0: i32, %arg1: memref<32x32xf32, #tpu.memory_space<vmem>>, %arg2: memref<32x32xf32, #tpu.memory_space<vmem>>, %arg3: memref<2x32x64xf32, #tpu.memory_space<vmem>>, %arg4: memref<2x1x64xf32, #tpu.memory_space<vmem>>, %arg5: memref<64x64xf32, #tpu.memory_space<vmem>>, %arg6: memref<64x128xf32, #tpu.memory_space<vmem>>, %arg7: memref<32x128xf32, #tpu.memory_space<vmem>>) attributes {dimension_semantics = [#tpu.dimension_semantics<parallel>], iteration_bounds = array<i64: 2>, scalar_prefetch = 0 : i64, scratch_operands = 0 : i64, tpu.core_type = #tpu.core_type<tc>, window_params = [{transform_indices = @transform_0, window_bounds = array<i64: 32, 32>}, {transform_indices = @transform_1, window_bounds = array<i64: 32, 32>}, {pipeline_mode = #tpu.pipeline_mode<synchronous>, transform_indices = @transform_2, window_bounds = array<i64: 2, 32, 64>}, {pipeline_mode = #tpu.pipeline_mode<synchronous>, transform_indices = @transform_3, window_bounds = array<i64: 2, 1, 64>}, {pipeline_mode = #tpu.pipeline_mode<synchronous>, transform_indices = @transform_4, window_bounds = array<i64: 64, 64>}, {pipeline_mode = #tpu.pipeline_mode<synchronous>, transform_indices = @transform_5, window_bounds = array<i64: 64, 128>}, {transform_indices = @transform_6, window_bounds = array<i64: 32, 128>}]} {
    %c0 = arith.constant 0 : index
    %c0_0 = arith.constant 0 : index
    %c0_1 = arith.constant 0 : index
    %0 = vector.load %arg3[%c0, %c0_0, %c0_1] : memref<2x32x64xf32, #tpu.memory_space<vmem>>, vector<1x32x64xf32>
    %1 = vector.shape_cast %0 : vector<1x32x64xf32> to vector<32x64xf32>
    %c1 = arith.constant 1 : index
    %c0_2 = arith.constant 0 : index
    %c0_3 = arith.constant 0 : index
    %2 = vector.load %arg3[%c1, %c0_2, %c0_3] : memref<2x32x64xf32, #tpu.memory_space<vmem>>, vector<1x32x64xf32>
    %3 = vector.shape_cast %2 : vector<1x32x64xf32> to vector<32x64xf32>
    %c0_4 = arith.constant 0 : index
    %c0_5 = arith.constant 0 : index
    %c0_6 = arith.constant 0 : index
    %4 = vector.load %arg4[%c0_4, %c0_5, %c0_6] : memref<2x1x64xf32, #tpu.memory_space<vmem>>, vector<1x1x64xf32>
    %5 = vector.shape_cast %4 : vector<1x1x64xf32> to vector<1x64xf32>
    %c1_7 = arith.constant 1 : index
    %c0_8 = arith.constant 0 : index
    %c0_9 = arith.constant 0 : index
    %6 = vector.load %arg4[%c1_7, %c0_8, %c0_9] : memref<2x1x64xf32, #tpu.memory_space<vmem>>, vector<1x1x64xf32>
    %7 = vector.shape_cast %6 : vector<1x1x64xf32> to vector<1x64xf32>
    %c0_10 = arith.constant 0 : index
    %c0_11 = arith.constant 0 : index
    %8 = vector.load %arg5[%c0_10, %c0_11] : memref<64x64xf32, #tpu.memory_space<vmem>>, vector<64x64xf32>
    %c0_12 = arith.constant 0 : index
    %c0_13 = arith.constant 0 : index
    %9 = vector.load %arg6[%c0_12, %c0_13] : memref<64x128xf32, #tpu.memory_space<vmem>>, vector<64x128xf32>
    %c0_14 = arith.constant 0 : index
    %c0_15 = arith.constant 0 : index
    %10 = vector.load %arg1[%c0_14, %c0_15] : memref<32x32xf32, #tpu.memory_space<vmem>>, vector<32x32xf32>
    %cst = arith.constant dense<0.000000e+00> : vector<32x64xf32>
    %11 = tpu.matmul %10, %1, %cst {dimension_numbers = #tpu.dot_dimension_numbers<[1], [0], [0], [1], [0, 0, 1, 1], [], []>} : vector<32x32xf32>, vector<32x64xf32>, vector<32x64xf32> -> vector<32x64xf32>
    %12 = vector.broadcast %5 : vector<1x64xf32> to vector<32x64xf32>
    %13 = arith.addf %11, %12 : vector<32x64xf32>
    %c0_16 = arith.constant 0 : index
    %c0_17 = arith.constant 0 : index
    %14 = vector.load %arg2[%c0_16, %c0_17] : memref<32x32xf32, #tpu.memory_space<vmem>>, vector<32x32xf32>
    %cst_18 = arith.constant dense<0.000000e+00> : vector<32x64xf32>
    %15 = tpu.matmul %14, %3, %cst_18 {dimension_numbers = #tpu.dot_dimension_numbers<[1], [0], [0], [1], [0, 0, 1, 1], [], []>} : vector<32x32xf32>, vector<32x64xf32>, vector<32x64xf32> -> vector<32x64xf32>
    %16 = vector.broadcast %7 : vector<1x64xf32> to vector<32x64xf32>
    %17 = arith.addf %15, %16 : vector<32x64xf32>
    %18 = tpu.iota {dimensions = array<i32: 1>} : vector<1x64xi32>
    %c32_i32 = arith.constant 32 : i32
    %19 = vector.broadcast %c32_i32 : i32 to vector<1x64xi32>
    %20 = arith.cmpi slt, %18, %19 : vector<1x64xi32>
    %21 = arith.extui %20 : vector<1x64xi1> to vector<1x64xi32>
    %22 = arith.sitofp %21 : vector<1x64xi32> to vector<1x64xf32>
    %23 = vector.extract_strided_slice %13 {offsets = [0, 0], sizes = [16, 64], strides = [1, 1]} : vector<32x64xf32> to vector<16x64xf32>
    %24 = vector.extract_strided_slice %17 {offsets = [0, 0], sizes = [16, 64], strides = [1, 1]} : vector<32x64xf32> to vector<16x64xf32>
    %25 = arith.mulf %23, %23 : vector<16x64xf32>
    %26 = vector.shape_cast %25 : vector<16x64xf32> to vector<1x16x64xf32>
    %cst_19 = arith.constant dense<0.000000e+00> : vector<1xf32>
    %27 = vector.multi_reduction <add>, %26, %cst_19 [1, 2] : vector<1x16x64xf32> to vector<1xf32>
    %28 = vector.shape_cast %27 : vector<1xf32> to vector<1x1x1xf32>
    %29 = vector.extract %28[0, 0, 0] : f32 from vector<1x1x1xf32>
    %30 = arith.mulf %24, %24 : vector<16x64xf32>
    %31 = vector.broadcast %22 : vector<1x64xf32> to vector<16x64xf32>
    %32 = arith.mulf %30, %31 : vector<16x64xf32>
    %33 = vector.shape_cast %32 : vector<16x64xf32> to vector<1x16x64xf32>
    %cst_20 = arith.constant dense<0.000000e+00> : vector<1xf32>
    %34 = vector.multi_reduction <add>, %33, %cst_20 [1, 2] : vector<1x16x64xf32> to vector<1xf32>
    %35 = vector.shape_cast %34 : vector<1xf32> to vector<1x1x1xf32>
    %36 = vector.extract %35[0, 0, 0] : f32 from vector<1x1x1xf32>
    %37 = arith.mulf %29, %36 : f32
    %38 = math.rsqrt %37 : f32
    %cst_21 = arith.constant dense<0.000000e+00> : vector<64x64xf32>
    %39 = tpu.matmul %24, %24, %cst_21 {dimension_numbers = #tpu.dot_dimension_numbers<[0], [0], [1], [1], [0, 1, 1, 1], [], []>} : vector<16x64xf32>, vector<16x64xf32>, vector<64x64xf32> -> vector<64x64xf32>
    %40 = arith.mulf %39, %8 : vector<64x64xf32>
    %cst_22 = arith.constant dense<0.000000e+00> : vector<64xf32>
    %41 = vector.multi_reduction <add>, %24, %cst_22 [0] : vector<16x64xf32> to vector<64xf32>
    %42 = vector.shape_cast %41 : vector<64xf32> to vector<1x64xf32>
    %cst_23 = arith.constant dense<0.000000e+00> : vector<16x64xf32>
    %43 = tpu.matmul %23, %40, %cst_23 {dimension_numbers = #tpu.dot_dimension_numbers<[1], [0], [0], [1], [0, 0, 1, 1], [], []>} : vector<16x64xf32>, vector<64x64xf32>, vector<16x64xf32> -> vector<16x64xf32>
    %44 = vector.broadcast %38 : f32 to vector<16x64xf32>
    %45 = arith.mulf %43, %44 : vector<16x64xf32>
    %46 = vector.broadcast %42 : vector<1x64xf32> to vector<16x64xf32>
    %47 = arith.addf %45, %46 : vector<16x64xf32>
    %48 = vector.broadcast %42 : vector<1x64xf32> to vector<16x64xf32>
    %49 = arith.mulf %23, %48 : vector<16x64xf32>
    %cst_24 = arith.constant dense<0.000000e+00> : vector<16x64xf32>
    %50 = tpu.matmul %49, %8, %cst_24 {dimension_numbers = #tpu.dot_dimension_numbers<[1], [0], [0], [1], [0, 0, 1, 1], [], []>} : vector<16x64xf32>, vector<64x64xf32>, vector<16x64xf32> -> vector<16x64xf32>
    %51 = vector.broadcast %38 : f32 to vector<16x64xf32>
    %52 = arith.mulf %50, %51 : vector<16x64xf32>
    %cst_25 = arith.constant 1.600000e+01 : f32
    %53 = vector.broadcast %cst_25 : f32 to vector<16x64xf32>
    %54 = arith.addf %52, %53 : vector<16x64xf32>
    %55 = tpu.reciprocal %54 {approx = true} : vector<16x64xf32> -> vector<16x64xf32>
    %56 = arith.mulf %54, %55 : vector<16x64xf32>
    %cst_26 = arith.constant 2.000000e+00 : f32
    %57 = vector.broadcast %cst_26 : f32 to vector<16x64xf32>
    %58 = arith.subf %57, %56 : vector<16x64xf32>
    %59 = arith.mulf %55, %58 : vector<16x64xf32>
    %60 = arith.mulf %47, %59 : vector<16x64xf32>
    %cst_27 = arith.constant dense<0.000000e+00> : vector<16x128xf32>
    %61 = tpu.matmul %60, %9, %cst_27 {dimension_numbers = #tpu.dot_dimension_numbers<[1], [0], [0], [1], [0, 0, 1, 1], [], []>} : vector<16x64xf32>, vector<64x128xf32>, vector<16x128xf32> -> vector<16x128xf32>
    %c0_28 = arith.constant 0 : index
    %c0_29 = arith.constant 0 : index
    %62 = vector.load %arg7[%c0_28, %c0_29] : memref<32x128xf32, #tpu.memory_space<vmem>>, vector<16x128xf32>
    tpu.vector_store %arg7[%c0_28, %c0_29], %61 {strides = array<i32>} : memref<32x128xf32, #tpu.memory_space<vmem>>, vector<16x128xf32>,
    %63 = vector.extract_strided_slice %13 {offsets = [16, 0], sizes = [16, 64], strides = [1, 1]} : vector<32x64xf32> to vector<16x64xf32>
    %64 = vector.extract_strided_slice %17 {offsets = [16, 0], sizes = [16, 64], strides = [1, 1]} : vector<32x64xf32> to vector<16x64xf32>
    %65 = arith.mulf %63, %63 : vector<16x64xf32>
    %66 = vector.shape_cast %65 : vector<16x64xf32> to vector<1x16x64xf32>
    %cst_30 = arith.constant dense<0.000000e+00> : vector<1xf32>
    %67 = vector.multi_reduction <add>, %66, %cst_30 [1, 2] : vector<1x16x64xf32> to vector<1xf32>
    %68 = vector.shape_cast %67 : vector<1xf32> to vector<1x1x1xf32>
    %69 = vector.extract %68[0, 0, 0] : f32 from vector<1x1x1xf32>
    %70 = arith.mulf %64, %64 : vector<16x64xf32>
    %71 = vector.broadcast %22 : vector<1x64xf32> to vector<16x64xf32>
    %72 = arith.mulf %70, %71 : vector<16x64xf32>
    %73 = vector.shape_cast %72 : vector<16x64xf32> to vector<1x16x64xf32>
    %cst_31 = arith.constant dense<0.000000e+00> : vector<1xf32>
    %74 = vector.multi_reduction <add>, %73, %cst_31 [1, 2] : vector<1x16x64xf32> to vector<1xf32>
    %75 = vector.shape_cast %74 : vector<1xf32> to vector<1x1x1xf32>
    %76 = vector.extract %75[0, 0, 0] : f32 from vector<1x1x1xf32>
    %77 = arith.mulf %69, %76 : f32
    %78 = math.rsqrt %77 : f32
    %cst_32 = arith.constant dense<0.000000e+00> : vector<64x64xf32>
    %79 = tpu.matmul %64, %64, %cst_32 {dimension_numbers = #tpu.dot_dimension_numbers<[0], [0], [1], [1], [0, 1, 1, 1], [], []>} : vector<16x64xf32>, vector<16x64xf32>, vector<64x64xf32> -> vector<64x64xf32>
    %80 = arith.mulf %79, %8 : vector<64x64xf32>
    %cst_33 = arith.constant dense<0.000000e+00> : vector<64xf32>
    %81 = vector.multi_reduction <add>, %64, %cst_33 [0] : vector<16x64xf32> to vector<64xf32>
    %82 = vector.shape_cast %81 : vector<64xf32> to vector<1x64xf32>
    %cst_34 = arith.constant dense<0.000000e+00> : vector<16x64xf32>
    %83 = tpu.matmul %63, %80, %cst_34 {dimension_numbers = #tpu.dot_dimension_numbers<[1], [0], [0], [1], [0, 0, 1, 1], [], []>} : vector<16x64xf32>, vector<64x64xf32>, vector<16x64xf32> -> vector<16x64xf32>
    %84 = vector.broadcast %78 : f32 to vector<16x64xf32>
    %85 = arith.mulf %83, %84 : vector<16x64xf32>
    %86 = vector.broadcast %82 : vector<1x64xf32> to vector<16x64xf32>
    %87 = arith.addf %85, %86 : vector<16x64xf32>
    %88 = vector.broadcast %82 : vector<1x64xf32> to vector<16x64xf32>
    %89 = arith.mulf %63, %88 : vector<16x64xf32>
    %cst_35 = arith.constant dense<0.000000e+00> : vector<16x64xf32>
    %90 = tpu.matmul %89, %8, %cst_35 {dimension_numbers = #tpu.dot_dimension_numbers<[1], [0], [0], [1], [0, 0, 1, 1], [], []>} : vector<16x64xf32>, vector<64x64xf32>, vector<16x64xf32> -> vector<16x64xf32>
    %91 = vector.broadcast %78 : f32 to vector<16x64xf32>
    %92 = arith.mulf %90, %91 : vector<16x64xf32>
    %cst_36 = arith.constant 1.600000e+01 : f32
    %93 = vector.broadcast %cst_36 : f32 to vector<16x64xf32>
    %94 = arith.addf %92, %93 : vector<16x64xf32>
    %95 = tpu.reciprocal %94 {approx = true} : vector<16x64xf32> -> vector<16x64xf32>
    %96 = arith.mulf %94, %95 : vector<16x64xf32>
    %cst_37 = arith.constant 2.000000e+00 : f32
    %97 = vector.broadcast %cst_37 : f32 to vector<16x64xf32>
    %98 = arith.subf %97, %96 : vector<16x64xf32>
    %99 = arith.mulf %95, %98 : vector<16x64xf32>
    %100 = arith.mulf %87, %99 : vector<16x64xf32>
    %cst_38 = arith.constant dense<0.000000e+00> : vector<16x128xf32>
    %101 = tpu.matmul %100, %9, %cst_38 {dimension_numbers = #tpu.dot_dimension_numbers<[1], [0], [0], [1], [0, 0, 1, 1], [], []>} : vector<16x64xf32>, vector<64x128xf32>, vector<16x128xf32> -> vector<16x128xf32>
    %c16 = arith.constant 16 : index
    %c0_39 = arith.constant 0 : index
    %102 = vector.load %arg7[%c16, %c0_39] : memref<32x128xf32, #tpu.memory_space<vmem>>, vector<16x128xf32>
    tpu.vector_store %arg7[%c16, %c0_39], %101 {strides = array<i32>} : memref<32x128xf32, #tpu.memory_space<vmem>>, vector<16x128xf32>,
    return
  }
  func.func @transform_0(%arg0: i32) -> (i32, i32) {
    %c0_i32 = arith.constant 0 : i32
    %c0_i32_0 = arith.constant 0 : i32
    return %arg0, %c0_i32 : i32, i32
  }
  func.func @transform_1(%arg0: i32) -> (i32, i32) {
    %c0_i32 = arith.constant 0 : i32
    %c0_i32_0 = arith.constant 0 : i32
    return %arg0, %c0_i32 : i32, i32
  }
  func.func @transform_2(%arg0: i32) -> (i32, i32, i32) {
    %c0_i32 = arith.constant 0 : i32
    %c0_i32_0 = arith.constant 0 : i32
    %c0_i32_1 = arith.constant 0 : i32
    %c0_i32_2 = arith.constant 0 : i32
    return %c0_i32, %c0_i32_0, %c0_i32_1 : i32, i32, i32
  }
  func.func @transform_3(%arg0: i32) -> (i32, i32, i32) {
    %c0_i32 = arith.constant 0 : i32
    %c0_i32_0 = arith.constant 0 : i32
    %c0_i32_1 = arith.constant 0 : i32
    %c0_i32_2 = arith.constant 0 : i32
    return %c0_i32, %c0_i32_0, %c0_i32_1 : i32, i32, i32
  }
  func.func @transform_4(%arg0: i32) -> (i32, i32) {
    %c0_i32 = arith.constant 0 : i32
    %c0_i32_0 = arith.constant 0 : i32
    %c0_i32_1 = arith.constant 0 : i32
    return %c0_i32, %c0_i32_0 : i32, i32
  }
  func.func @transform_5(%arg0: i32) -> (i32, i32) {
    %c0_i32 = arith.constant 0 : i32
    %c0_i32_0 = arith.constant 0 : i32
    %c0_i32_1 = arith.constant 0 : i32
    return %c0_i32, %c0_i32_0 : i32, i32
  }
  func.func @transform_6(%arg0: i32) -> (i32, i32) {
    %c0_i32 = arith.constant 0 : i32
    %c0_i32_0 = arith.constant 0 : i32
    return %arg0, %c0_i32 : i32, i32
  }
}

</mosaic_0001>

<bundles_post_ra>
// kernel: tpu_custom_call.1
= control target key start
LH: loop header
LB: loop body
LE: loop exit
PB: predicated region body
PF: predicated region fallthrough
CT: control target
= control target key end

     0   :  { %11 = vsyncpa [#allocation3], 0  ;;  %s2540_s0 = inlined_call_operand.vmem [shape: f32[64,32], index: 0, kind: input, shape index: {}]   ;;  %s2541_s1 = inlined_call_operand.vmem [shape: f32[64,32], index: 1, kind: input, shape index: {}]   ;;  %s2542_s2 = inlined_call_operand.vmem [shape: f32[2,32,64], index: 2, kind: input, shape index: {}]   ;;  %s2543_s3 = inlined_call_operand.vmem [shape: f32[2,1,64], index: 3, kind: input, shape index: {}]   ;;  %s2544_s4 = inlined_call_operand.vmem [shape: f32[64,64], index: 4, kind: input, shape index: {}]   ;;  %s2545_s5 = inlined_call_operand.vmem [shape: f32[64,128], index: 5, kind: input, shape index: {}]   ;;  %s2546_s6 = inlined_call_operand.hbm [shape: f32[64,128], index: 6, kind: output, shape index: {}]  }
   0x1   :  { %13 = vsyncpa [#allocation3 + $0x1], 0  ;;  %s2187_s21 = smov 0   ;;  %s2189_s22 = smov 0  }
   0x2   :  { %s2191_s23 = smov 0   ;;  %s2193_s24 = smov 0  }
   0x3 LB: > { %s2208_s25 = sadd.s32 4294967295, %s2146_s24   ;;  %s1569_s26 = sadd.s32 4294967294, %s2146_s24   ;;  %s2146_s24 = sphi %s2193_s24, %s2552_s24   ;;  %s2142_s23 = sphi %s2191_s23, %s2551_s23   ;;  %s2138_s22 = sphi %s2189_s22, %s2550_s22   ;;  %s2134_s21 = sphi %s2187_s21, %s2549_s21  }
   0x4   : > { %s2212_s27 = sadd.s32 1, %s2146_s24   ;;  %s162_s28 = sadd.s32 1, %s2142_s23 }
   0x5   : > { %s159_s29 = ssub.s32 %s2146_s24, %s2212_s27  ;;  %p172_p0 = scmp.ne.s32.totalorder %s2142_s23, %s2138_s22 }
   0x6   : > { %p160_p1 = scmp.eq.s32.totalorder %s159_s29, 0  ;;  %p173_p2 = scmp.eq.s32.totalorder %s2208_s25, 1 }
   0x7   : > { %p178_p3 = scmp.ne.s32.totalorder %s2138_s22, %s2134_s21  ;;  %p179_p4 = scmp.eq.s32.totalorder %s1569_s26, 1 }
   0x8   : > { %s2223_s30 = scalar_select %p160_p1, %s2142_s23, %s162_s28  }
   0x9   : > { %p2225_p5 = por %p173_p2, %p172_p0  ;;  %p2229_p6 = por %p179_p4, %p178_p3 }
   0xa   : > { %p1572_p7 = scmp.ge.s32.totalorder %s2146_s24, 1  ;;  %p227_p8 = scmp.lt.s32.totalorder %s2146_s24, 3 }
   0xc   : > { %p228_p9 = pnand %p1572_p7, %p227_p8 }
   0xd   : > { %v275_v0 = vld [vmem:[%s2542_s2] sm:$0xff] (!%p228_p9)  ;;  %v276_v1 = vld [vmem:[%s2542_s2 + $0x8] sm:$0xff] (!%p228_p9)  ;;  %v277_v2 = vld [vmem:[%s2542_s2 + $0x10] sm:$0xff] (!%p228_p9)  ;;  %s1574_s15 = sshll.u32 (!%p228_p9), %s2208_s25, 2  ;;  %vm313_vm0 = vcmask (!%p228_p9), 261120   ;;  %v518_v21 = vlaneseq (!%p228_p9)  ;;  %vm525_vm1 = vcmask (!%p228_p9), 523264  }
   0xe   : > { %231 = sbr.rel (%p228_p9) target bundleno = 1328 (0x530), region = 44  ;;  %v1898_v3 = vpack.c.bf16 (!%p228_p9), %v276_v1, %v275_v0  ;;  %v278_v4 = vld [vmem:[%s2542_s2 + $0x18] sm:$0xff] (!%p228_p9)  ;;  %p263_p10 = scmp.lt.s32.totalorder (!%p228_p9), %s1574_s15, 7  ;;  %v1578_v6 = vld [vmem:[%s2542_s2 + $0x20] sm:$0xff] (!%p228_p9)  ;;  %v1579_v7 = vld [vmem:[%s2542_s2 + $0x28] sm:$0xff] (!%p228_p9)  ;;  %v2148_v36 = vmov (!%p228_p9), 0.0  }
   0xf   : > { %v1902_v5 = vpack.c.bf16 (!%p228_p9), %v278_v4, %v277_v2  ;;  %v1906_v8 = vpack.c.bf16 (!%p228_p9), %v1579_v7, %v1578_v6  ;;  %v1580_v9 = vld [vmem:[%s2542_s2 + $0x30] sm:$0xff] (!%p228_p9)  ;;  %v1581_v10 = vld [vmem:[%s2542_s2 + $0x38] sm:$0xff] (!%p228_p9)  ;;  %v1583_v20 = vld [vmem:[%s2543_s3] ss:$0 sm:$0xff] (!%p228_p9)  ;;  %v519_v26 = vand.u32 (!%p228_p9), 127, %v518_v21  ;;  %vm590_vm3 = vcmask (!%p228_p9), 130048  }
  0x10   : > { %1899 = vmatprep.subr.bf16.mxu1 (!%p228_p9), %v1898_v3  ;;  %v1910_v14 = vpack.c.bf16 (!%p228_p9), %v1581_v10, %v1580_v9  ;;  %v1588_v31 = vld [vmem:[%s2543_s3 + $0x1] ss:$0 sm:$0xff] (!%p228_p9)  ;;  %v2308_v0 = vld [vmem:[%s2544_s4 + $0x8] sm:$0xff] (!%p228_p9)  ;;  %s259_s16 = sand.u32 (!%p228_p9), 1, %s2138_s22   ;;  %s1627_s26 = sshll.u32 (!%p228_p9), %s2208_s25, 9 }
  0x11   : > { %1901 = vmatpush3.bf16.msra.mxu1 (!%p228_p9), %v1898_v3  ;;  %vm520_vm2 = vcmp.lt.s32.totalorder (!%p228_p9), %v519_v26, 32  ;;  %v2303_v63 = vld [vmem:[%s2544_s4] sm:$0xff] (!%p228_p9)  ;;  %v2352_v21 = vld [vmem:[%s2544_s4 + $0x28] sm:$0xff] (!%p228_p9)  ;;  %s2149_s25 = smov (!%p228_p9), [#allocation2]  }
  0x12   : > { %1903 = vmatprep.subr.bf16.mxu1 (!%p228_p9), %v1902_v5  ;;  %v1593_v37 = vsel (!%p228_p9), %vm520_vm2, 1.0, %v2148_v36  ;;  %v2312_v1 = vpack.c.bf16 (!%p228_p9), %v2308_v0, %v2303_v63 }
  0x15   : > { %s2554_s15 = smov (!%p263_p10, %s1574_s15), 7  ;;  %1905 = vmatpush3.bf16.msra.mxu1 %v1902_v5 }
  0x16   : > { %s1575_s28 = sshll.u32 %s2554_s15, 3  ;;  %1907 = vmatprep.subr.bf16.mxu1 %v1906_v8 }
  0x17   : > { %s266_s10 = scalar_lea.vmem %s2540_s0, %s1575_s28  ;;  %s272_s17 = scalar_lea.vmem %s2541_s1, %s1575_s28 }
  0x18   : > { %v303_v11 = vld [vmem:[%s266_s10] sm:$0xff]  ;;  %v304_v12 = vld [vmem:[%s266_s10 + $0x8] sm:$0xff]  ;;  %v305_v13 = vld [vmem:[%s266_s10 + $0x10] sm:$0xff] }
  0x19   : > { %1732 = vmatprep.mubr.msk.f32.mxu1 %vm313_vm0, %v303_v11  ;;  %v306_v15 = vld [vmem:[%s266_s10 + $0x18] sm:$0xff]  ;;  %v411_v16 = vld [vmem:[%s272_s17] sm:$0xff]  ;;  %v412_v17 = vld [vmem:[%s272_s17 + $0x8] sm:$0xff] }
  0x1a   : > { %1733 = vmatmul.mubr.msk.f32.vlgmr.msra.gmra.mrb[0].mxu1 %vm313_vm0, %v304_v12  ;;  %v413_v18 = vld [vmem:[%s272_s17 + $0x10] sm:$0xff]  ;;  %v414_v19 = vld [vmem:[%s272_s17 + $0x18] sm:$0xff]  ;;  %s1573_s17 = sshll.u32 %s259_s16, 5 }
  0x1b   : > { %1909 = vmatpush3.bf16.msra.mxu1 %v1906_v8  ;;  %1735 = vmatprep.mubr.msk.f32.mxu1 %vm313_vm0, %v305_v13  ;;  %s2480_s18 = scalar_lea.vmem [#allocation2], %s1573_s17 }
  0x1c   : > { %1911 = vmatprep.subr.bf16.mxu1 %v1910_v14  ;;  %s1495_s20 = sshll.u32 %s2480_s18, 4  ;;  %s2488_s20 = int_to_ptr.vmem [resolvable:$true] %s1495_s20 }
  0x1e   : > { %1736 = vmatmul.mubr.msk.f32.gmra.mrb[2].mxu1 %vm313_vm0, %v306_v15  ;;  %v2337_v15 = vld [vmem:[%s2544_s4 + $0x18] sm:$0xff] }
  0x1f   : > { %1913 = vmatpush3.bf16.msra.mxu1 %v1910_v14  ;;  %1746 = vmatprep.mubr.msk.f32.mxu1 %vm313_vm0, %v411_v16  ;;  %v2332_v14 = vld [vmem:[%s2544_s4 + $0x10] sm:$0xff] }
  0x20   : > { %v2342_v16 = vpack.c.bf16 %v2337_v15, %v2332_v14 }
  0x22   : > { %1747 = vmatmul.mubr.msk.f32.vlgmr.msra.gmra.mrb[4].mxu1 %vm313_vm0, %v412_v17 }
  0x23   : > { %1749 = vmatprep.mubr.msk.f32.mxu1 %vm313_vm0, %v413_v18 }
  0x26   : > { %1750 = vmatmul.mubr.msk.f32.gmra.mrb[6].mxu1 %vm313_vm0, %v414_v19 }
  0xed   : > { %v1734_v22 = vpop.f32.mrb[0].mxu1 }
  0xee   : > { %v2277_v23 = vadd.f32 %v1734_v22, %v1583_v20  ;;  %v392_v24 = vpop.f32.mrb[1].mxu1 }
  0xef   : > { %v2279_v25 = vadd.f32 %v1583_v20, %v392_v24 }
  0xf0   : > { %v524_v4 = vmul.f32 %v2277_v23, %v2277_v23 }
  0xf1   : > { %v1737_v27 = vpop.f32.mrb[2].mxu1  ;;  %1784 = vmatprep.mubr.msk.f32.mxu1 %vm525_vm1, %v2279_v25  ;;  %v523_v3 = vmul.f32 %v2279_v25, %v2279_v25 }
  0xf2   : > { %v2283_v28 = vadd.f32 %v1737_v27, %v1583_v20  ;;  %v402_v29 = vpop.f32.mrb[3].mxu1  ;;  %v527_v8 = vsel %vm525_vm1, %v524_v4, 0.0  ;;  %v2364_v27 = vld [vmem:[%s2544_s4 + $0x30] sm:$0xff] }
  0xf3   : > { %v2285_v30 = vadd.f32 %v1583_v20, %v402_v29  ;;  %v526_v7 = vsel %vm525_vm1, %v523_v3, 0.0  ;;  %v2347_v20 = vld [vmem:[%s2544_s4 + $0x20] sm:$0xff]  ;;  %v2369_v29 = vld [vmem:[%s2544_s4 + $0x38] sm:$0xff] }
  0xf4   : > { %v1004_v6 = vmul.f32 %v2283_v28, %v2283_v28  ;;  %v528_v11 = vadd.f32 %v527_v8, %v526_v7  ;;  %v2359_v22 = vpack.c.bf16 %v2352_v21, %v2347_v20 }
  0xf5   : > { %v1748_v32 = vpop.f32.mrb[4].mxu1  ;;  %v1003_v5 = vmul.f32 %v2285_v30, %v2285_v30 }
  0xf6   : > { %v505_v33 = vadd.f32 %v1748_v32, %v1588_v31  ;;  %v499_v34 = vpop.f32.mrb[5].mxu1  ;;  %v1006_v10 = vsel %vm525_vm1, %v1004_v6, 0.0  ;;  %v2376_v32 = vpack.c.bf16 %v2369_v29, %v2364_v27 }
  0xf7   : > { %v500_v35 = vadd.f32 %v1588_v31, %v499_v34  ;;  %v1005_v9 = vsel %vm525_vm1, %v1003_v5, 0.0 }
  0xf8   : > { %v729_v38 = vsel %vm525_vm1, %v505_v33, 0.0  ;;  %v539_v39 = vmul.f32 %v505_v33, %v505_v33  ;;  %v1007_v12 = vadd.f32 %v1006_v10, %v1005_v9 }
  0xf9   : > { %v728_v40 = vsel %vm525_vm1, %v500_v35, 0.0  ;;  %v1751_v41 = vpop.f32.mrb[6].mxu1  ;;  %558 = vxpose.xlu0.b32.start [1/2] (short) (narrow) %v500_v35, 64  ;;  %v1914_v42 = vpack.c.bf16 %v505_v33, %v500_v35  ;;  %v538_v43 = vmul.f32 %v500_v35, %v500_v35 }
  0xfa   : > { %v730_v44 = vadd.f32 %v729_v38, %v728_v40  ;;  %v515_v45 = vadd.f32 %v1751_v41, %v1588_v31  ;;  %v509_v46 = vpop.f32.mrb[7].mxu1  ;;  %v541_v47 = vmul.f32 %v1593_v37, %v539_v39 }
  0xfb   : > { %v510_v48 = vadd.f32 %v1588_v31, %v509_v46  ;;  %1915 = vmatprep.subr.bf16.mxu0 %v1914_v42  ;;  %v540_v49 = vmul.f32 %v1593_v37, %v538_v43 }
  0xfc   : > { %v1207_v50 = vsel %vm525_vm1, %v515_v45, 0.0  ;;  %1917 = vmatpush3.bf16.msra.mxu0 %v1914_v42  ;;  %v543_v51 = vsel %vm525_vm1, %v541_v47, 0.0  ;;  %v1018_v52 = vmul.f32 %v515_v45, %v515_v45  ;;  %v731_v17 = vrot.slane %v730_v44, 4 }
  0xfd   : > { %v1206_v53 = vsel %vm525_vm1, %v510_v48, 0.0  ;;  %1037 = vxpose.xlu1.b32.start [1/2] (short) (narrow) %v510_v48, 64  ;;  %559 = vxpose.xlu0.b32.end [2/2] (short) (narrow) %v505_v33, 64  ;;  %v542_v54 = vsel %vm525_vm1, %v540_v49, 0.0  ;;  %v1017_v55 = vmul.f32 %v510_v48, %v510_v48  ;;  %v2315_v2 = vpack.c.bf16 %v515_v45, %v510_v48 }
  0xfe   : > { %v2296_v56 = vadd.f32 %v1207_v50, %v1206_v53  ;;  %v544_v57 = vadd.f32 %v543_v51, %v542_v54  ;;  %v1020_v58 = vmul.f32 %v1593_v37, %v1018_v52  ;;  %1935 = vmatprep.subr.bf16.mxu0 %v2312_v1  ;;  %v732_v24 = vadd.f32 %v731_v17, %v730_v44 }
  0xff   : > { %v1019_v59 = vmul.f32 %v1593_v37, %v1017_v55 }
 0x100   : > { %v1022_v60 = vsel %vm525_vm1, %v1020_v58, 0.0  ;;  %v733_v33 = vrot.slane %v732_v24, 2 }
 0x101   : > { %1038 = vxpose.xlu1.b32.end [2/2] (short) (narrow) %v515_v45, 64  ;;  %v1021_v61 = vsel %vm525_vm1, %v1019_v59, 0.0 }
 0x102   : > { %v1023_v62 = vadd.f32 %v1022_v60, %v1021_v61  ;;  %v734_v35 = vadd.f32 %v733_v33, %v732_v24 }
 0x104   : > { %v735_v38 = vrot.slane %v734_v35, 1 }
 0x106   : > { %v2385_v42 = vadd.f32 %v735_v38, %v734_v35 }
 0x108   : > { %v823_v44 = vmul.f32 %v2385_v42, %v2279_v25  ;;  %v824_v46 = vmul.f32 %v2385_v42, %v2277_v23 }
 0x140   : > { %545 = vadd.xlane.f32.xlu1 %v544_v57 }
 0x142   : > { %529 = vadd.xlane.f32.xlu0 %v528_v11 }
 0x144   : > { %1008 = vadd.xlane.f32.xlu1 %v1007_v12 }
 0x148   : > { %1024 = vadd.xlane.f32.xlu1 %v1023_v62 }
 0x179   : > { %v574_v13 = vpop.trf.xlu0 }
 0x17a   : > { %1756 = vmatprep.mubr.msk.f32.mxu0 %vm590_vm3, %v574_v13 }
 0x17d   : > { %v575_v18 = vpop.trf.xlu0  ;;  %v1053_v19 = vpop.trf.xlu1 }
 0x17e   : > { %1757 = vmatmul.mubr.msk.f32.vlgmr.msra.gmra.mrb[0].mxu0 %vm590_vm3, %v575_v18 }
 0x17f   : > { %1937 = vmatpush3.bf16.msra.mxu0 %v2312_v1 }
 0x180   : > { %1939 = vmatprep.subr.bf16.mxu0 %v2342_v16 }
 0x181   : > { %v576_v26 = vpop.trf.xlu0  ;;  %v1054_v31 = vpop.trf.xlu1 }
 0x182   : > { %1759 = vmatprep.mubr.msk.f32.mxu0 %vm590_vm3, %v576_v26 }
 0x183   : > { %1941 = vmatpush3.bf16.msra.mxu0 %v2342_v16 }
 0x184   : > { %1943 = vmatprep.subr.bf16.mxu0 %v2359_v22 }
 0x185   : > { %v577_v34 = vpop.trf.xlu0  ;;  %v1055_v37 = vpop.trf.xlu1 }
 0x186   : > { %1760 = vmatmul.mubr.msk.f32.gmra.mrb[2].mxu0 %vm590_vm3, %v577_v34 }
 0x187   : > { %1945 = vmatpush3.bf16.msra.mxu0 %v2359_v22 }
 0x188   : > { %1947 = vmatprep.subr.bf16.mxu0 %v2376_v32 }
 0x189   : > { %v578_v36 = vpop.trf.xlu0  ;;  %v1056_v40 = vpop.trf.xlu1 }
 0x18a   : > { %1762 = vmatprep.mubr.msk.f32.mxu0 %vm590_vm3, %v578_v36 }
 0x18b   : > { %1949 = vmatpush3.bf16.msra.mxu0 %v2376_v32 }
 0x18c   : > { %1967 = vmatprep.subr.bf16.mxu0 %v2315_v2 }
 0x18d   : > { %v579_v39 = vpop.trf.xlu0  ;;  %v1057_v45 = vpop.trf.xlu1 }
 0x18e   : > { %1763 = vmatmul.mubr.msk.f32.gmra.mrb[4].mxu0 %vm590_vm3, %v579_v39 }
 0x191   : > { %v580_v41 = vpop.trf.xlu0  ;;  %v1058_v47 = vpop.trf.xlu1 }
 0x192   : > { %1765 = vmatprep.mubr.msk.f32.mxu0 %vm590_vm3, %v580_v41 }
 0x195   : > { %v581_v43 = vpop.trf.xlu0  ;;  %v1059_v25 = vpop.trf.xlu1 }
 0x196   : > { %1766 = vmatmul.mubr.msk.f32.gmra.mrb[6].mxu0 %vm590_vm3, %v581_v43 }
 0x197   : > { %1803 = vmatprep.mubr.msk.f32.mxu0 %vm525_vm1, %v823_v44 }
 0x199   : > { %v1060_v48 = vpop.trf.xlu1 }
 0x19a   : > { %1804 = vmatmul.mubr.msk.f32.vlgmr.msra.gmra.mrb[8].mxu0 %vm525_vm1, %v824_v46 }
 0x19b   : > { %1969 = vmatpush3.bf16.msra.mxu0 %v2315_v2  ;;  %1829 = vmatprep.mubr.msk.f32.mxu0 %vm590_vm3, %v1053_v19 }
 0x19e   : > { %1830 = vmatmul.mubr.msk.f32.vlgmr.msra.gmra.mrb[10].mxu0 %vm590_vm3, %v1054_v31 }
 0x19f   : > { %1832 = vmatprep.mubr.msk.f32.mxu0 %vm590_vm3, %v1055_v37 }
 0x1a2   : > { %1833 = vmatmul.mubr.msk.f32.gmra.mrb[12].mxu0 %vm590_vm3, %v1056_v40 }
 0x1a3   : > { %1835 = vmatprep.mubr.msk.f32.mxu0 %vm590_vm3, %v1057_v45 }
 0x1a6   : > { %1836 = vmatmul.mubr.msk.f32.gmra.mrb[14].mxu0 %vm590_vm3, %v1058_v47 }
 0x1a7   : > { %1838 = vmatprep.mubr.msk.f32.mxu0 %vm590_vm3, %v1059_v25 }
 0x1aa   : > { %1839 = vmatmul.mubr.msk.f32.gmra.mrb[16].mxu0 %vm590_vm3, %v1060_v48 }
 0x1ab   : > { %1857 = vmatprep.mubr.msk.f32.mxu0 %vm525_vm1, %v2285_v30 }
 0x1cd   : > { %v546_v49 = vpop.xlane.xlu1 %545 }
 0x1ce   : > { %v547_v50 = vrot.slane %v546_v49, 4 }
 0x1cf   : > { %v530_v51 = vpop.xlane.xlu0 %529 }
 0x1d0   : > { %v548_v52 = vadd.f32 %v547_v50, %v546_v49  ;;  %v531_v53 = vrot.slane %v530_v51, 4 }
 0x1d1   : > { %v1009_v3 = vpop.xlane.xlu1 %1008 }
 0x1d2   : > { %v549_v54 = vrot.slane %v548_v52, 2  ;;  %v532_v55 = vadd.f32 %v531_v53, %v530_v51  ;;  %v1010_v6 = vrot.slane %v1009_v3, 4  ;;  %v296_v53 = vld [vmem:[%s2545_s5 + $0x8] sm:$0xff] }
 0x1d4   : > { %v533_v57 = vrot.slane %v532_v55, 2  ;;  %v550_v58 = vadd.f32 %v549_v54, %v548_v52  ;;  %v1011_v8 = vadd.f32 %v1010_v6, %v1009_v3  ;;  %v295_v52 = vld [vmem:[%s2545_s5] sm:$0xff] }
 0x1d5   : > { %v1025_v4 = vpop.xlane.xlu1 %1024 }
 0x1d6   : > { %v534_v59 = vadd.f32 %v533_v57, %v532_v55  ;;  %v551_v60 = vrot.slane %v550_v58, 1  ;;  %v1026_v5 = vrot.slane %v1025_v4, 4  ;;  %v1012_v10 = vrot.slane %v1011_v8, 2 }
 0x1d8   : > { %v535_v61 = vrot.slane %v534_v59, 1  ;;  %v552_v2 = vadd.f32 %v551_v60, %v550_v58  ;;  %v1027_v7 = vadd.f32 %v1026_v5, %v1025_v4  ;;  %v1013_v13 = vadd.f32 %v1012_v10, %v1011_v8 }
 0x1da   : > { %v536_v62 = vadd.f32 %v535_v61, %v534_v59  ;;  %v1028_v9 = vrot.slane %v1027_v7, 2  ;;  %v1014_v18 = vrot.slane %v1013_v13, 1  ;;  %v1950_v59 = vpack.c.bf16 %v296_v53, %v295_v52 }
 0x1dc   : > { %2018 = vpush %v536_v62  ;;  %v1029_v12 = vadd.f32 %v1028_v9, %v1027_v7  ;;  %v1015_v26 = vadd.f32 %v1014_v18, %v1013_v13  ;;  %v297_v62 = vld [vmem:[%s2545_s5 + $0x10] sm:$0xff] }
 0x1dd   : > { %2020 = vpush %v552_v2  ;;  %v298_v2 = vld [vmem:[%s2545_s5 + $0x18] sm:$0xff] }
 0x1de   : > { %v1030_v17 = vrot.slane %v1029_v12, 1  ;;  %v1954_v5 = vpack.c.bf16 %v298_v2, %v297_v62 }
 0x1e0   : > { %v1031_v19 = vadd.f32 %v1030_v17, %v1029_v12 }
 0x20d   : > { %s2019_s29 = spop %2018 }
 0x20e   : > { %s2021_s9 = spop %2020 }
 0x20f   : > { %s554_s10 = smul.f32 %s2021_s9, %s2019_s29  ;;  %s2493_s9 = scalar_lea.hbm %s2546_s6, %s1627_s26 }
 0x211   : > { %v555_v11 = vstv %s554_s10  ;;  %s2499_s10 = scalar_lea.sflag [#allocation3], %s259_s16 }
 0x212   : > { %2072 = vrsqrt.f32 %v555_v11 }
 0x21c   : > { %v2073_v24 = vpop.eup %2072 }
 0x21d   : > { %2022 = vpush %v2073_v24 }
 0x21e   : > { %2024 = vpush %v1015_v26 }
 0x21f   : > { %2026 = vpush %v1031_v19 }
 0x24e   : > { %s2406_s11 = spop %2022 }
 0x24f   : > { %s2025_s12 = spop %2024  ;;  %v2423_v55 = vstv %s2406_s11  ;;  %s2084_s11 = scalar_lea.vmem %s2488_s20, 512 }
 0x250   : > { %s2027_s13 = spop %2026  ;;  %p2085_p11 = scmp.ne.s32.totalorder %s2488_s20, %s2084_s11 }
 0x251   : > { %s1033_s14 = smul.f32 %s2027_s13, %s2025_s12  ;;  %v1758_v31 = vpop.f32.mrb[0].mxu0  ;;  %s2088_s12 = sshll.u32 %s2149_s25, 4  ;;  %s2089_s12 = int_to_ptr.vmem [resolvable:$false] %s2088_s12 }
 0x252   : > { %v721_v33 = vmul.f32 %v1758_v31, %v2308_v0  ;;  %v681_v34 = vpop.f32.mrb[1].mxu0  ;;  %p2086_p12 = pnand %p2085_p11, %p2225_p5  ;;  %s2090_s13 = scalar_lea.vmem %s2089_s12, 1024 }
 0x253   : > { %v1034_v35 = vstv %s1033_s14  ;;  %v720_v36 = vmul.f32 %v681_v34, %v2303_v63  ;;  %p2091_p0 = scmp.lt.s32.totalorder %s2488_s20, %s2089_s12  ;;  %p2092_p1 = scmp.lt.s32.totalorder %s2090_s13, %s2084_s11 }
 0x254   : > { %2074 = vrsqrt.f32 %v1034_v35  ;;  %p2087_p13 = pneg %p2086_p12 }
 0x255   : > { %v1918_v37 = vpack.c.bf16 %v721_v33, %v720_v36  ;;  %v302_v33 = vld [vmem:[%s2545_s5 + $0x38] sm:$0xff]  ;;  %p2093_p2 = por %p2092_p1, %p2091_p0 }
 0x257   : > { %1919 = vmatprep.subr.bf16.mxu1 %v1918_v37  ;;  %p2094_p3 = pnand %p2093_p2, %p2087_p13 }
 0x258   : > { %1921 = vmatpush3.bf16.msra.mxu1 %v1918_v37  ;;  %v1209_v37 = vrot.slane %v2296_v56, 4 }
 0x259   : > { %v1761_v38 = vpop.f32.mrb[2].mxu0 }
 0x25a   : > { %v723_v39 = vmul.f32 %v1761_v38, %v2337_v15  ;;  %v691_v40 = vpop.f32.mrb[3].mxu0  ;;  %v1210_v38 = vadd.f32 %v1209_v37, %v2296_v56 }
 0x25b   : > { %v722_v41 = vmul.f32 %v691_v40, %v2332_v14 }
 0x25c   : > { %v1211_v40 = vrot.slane %v1210_v38, 2 }
 0x25d   : > { %v1922_v43 = vpack.c.bf16 %v723_v39, %v722_v41 }
 0x25e   : > { %v2075_v44 = vpop.eup %2074 }
 0x25f   : > { %2028 = vpush %v2075_v44  ;;  %1923 = vmatprep.subr.bf16.mxu1 %v1922_v43  ;;  %v1212_v44 = vadd.f32 %v1211_v40, %v1210_v38 }
 0x260   : > { %1925 = vmatpush3.bf16.msra.mxu1 %v1922_v43 }
 0x261   : > { %v1764_v45 = vpop.f32.mrb[4].mxu0 }
 0x262   : > { %v725_v46 = vmul.f32 %v1764_v45, %v2352_v21  ;;  %v701_v47 = vpop.f32.mrb[5].mxu0 }
 0x263   : > { %v724_v25 = vmul.f32 %v701_v47, %v2347_v20  ;;  %v1213_v47 = vrot.slane %v1212_v44, 1 }
 0x265   : > { %v1926_v48 = vpack.c.bf16 %v725_v46, %v724_v25 }
 0x267   : > { %1927 = vmatprep.subr.bf16.mxu1 %v1926_v48 }
 0x268   : > { %1929 = vmatpush3.bf16.msra.mxu1 %v1926_v48 }
 0x269   : > { %v1767_v49 = vpop.f32.mrb[6].mxu0 }
 0x26a   : > { %v727_v50 = vmul.f32 %v1767_v49, %v2369_v29  ;;  %v711_v51 = vpop.f32.mrb[7].mxu0 }
 0x26b   : > { %v726_v54 = vmul.f32 %v711_v51, %v2364_v27 }
 0x26d   : > { %v1930_v57 = vpack.c.bf16 %v727_v50, %v726_v54  ;;  %v1805_v58 = vpop.f32.mrb[8].mxu0 }
 0x26e   : > { %v907_v60 = vmul.f32 %v1805_v58, %v2423_v55  ;;  %v897_v61 = vpop.f32.mrb[9].mxu0 }
 0x26f   : > { %v906_v3 = vmul.f32 %v897_v61, %v2423_v55  ;;  %1931 = vmatprep.subr.bf16.mxu1 %v1930_v57 }
 0x270   : > { %1933 = vmatpush3.bf16.msra.mxu1 %v1930_v57  ;;  %v909_v35 = vadd.f32 16.0, %v907_v60  ;;  %v1214_v57 = vadd.f32 %v1213_v47, %v1212_v44 }
 0x271   : > { %v1831_v4 = vpop.f32.mrb[10].mxu0  ;;  %1951 = vmatprep.subr.bf16.mxu1 %v1950_v59  ;;  %v908_v36 = vadd.f32 16.0, %v906_v3 }
 0x272   : > { %v1199_v6 = vmul.f32 %v1831_v4, %v2308_v0  ;;  %v1159_v7 = vpop.f32.mrb[11].mxu0  ;;  %2076 = vrcp.f32 %v909_v35  ;;  %v1301_v60 = vmul.f32 %v1214_v57, %v2285_v30  ;;  %v1302_v30 = vmul.f32 %v1214_v57, %v2283_v28 }
 0x273   : > { %v1198_v8 = vmul.f32 %v1159_v7, %v2303_v63  ;;  %1785 = vmatmul.mubr.msk.f32.vlgmr.msra.gmra.mrb[8].mxu1 %vm525_vm1, %v2277_v23  ;;  %2078 = vrcp.f32 %v908_v36 }
 0x274   : > { %1953 = vmatpush3.bf16.msra.mxu1 %v1950_v59 }
 0x275   : > { %v1970_v9 = vpack.c.bf16 %v1199_v6, %v1198_v8  ;;  %v1834_v10 = vpop.f32.mrb[12].mxu0  ;;  %1955 = vmatprep.subr.bf16.mxu1 %v1954_v5 }
 0x276   : > { %v1201_v11 = vmul.f32 %v1834_v10, %v2337_v15  ;;  %v1169_v12 = vpop.f32.mrb[13].mxu0 }
 0x277   : > { %v1200_v13 = vmul.f32 %v1169_v12, %v2332_v14  ;;  %1971 = vmatprep.subr.bf16.mxu0 %v1970_v9 }
 0x278   : > { %1973 = vmatpush3.bf16.msra.mxu0 %v1970_v9  ;;  %1957 = vmatpush3.bf16.msra.mxu1 %v1954_v5 }
 0x279   : > { %v1974_v17 = vpack.c.bf16 %v1201_v11, %v1200_v13  ;;  %v1837_v0 = vpop.f32.mrb[14].mxu0 }
 0x27a   : > { %v1203_v18 = vmul.f32 %v1837_v0, %v2352_v21  ;;  %v1179_v63 = vpop.f32.mrb[15].mxu0  ;;  %v300_v21 = vld [vmem:[%s2545_s5 + $0x28] sm:$0xff] }
 0x27b   : > { %v1202_v19 = vmul.f32 %v1179_v63, %v2347_v20  ;;  %1975 = vmatprep.subr.bf16.mxu0 %v1974_v17  ;;  %v299_v20 = vld [vmem:[%s2545_s5 + $0x20] sm:$0xff] }
 0x27c   : > { %1977 = vmatpush3.bf16.msra.mxu0 %v1974_v17  ;;  %v2077_v39 = vpop.eup %2076 }
 0x27d   : > { %v1978_v23 = vpack.c.bf16 %v1203_v18, %v1202_v19  ;;  %v1840_v24 = vpop.f32.mrb[16].mxu0  ;;  %v2079_v41 = vpop.eup %2078  ;;  %v913_v43 = vmul.f32 %v2077_v39, %v909_v35 }
 0x27e   : > { %v1205_v26 = vmul.f32 %v1840_v24, %v2369_v29  ;;  %v1189_v15 = vpop.f32.mrb[17].mxu0  ;;  %v301_v29 = vld [vmem:[%s2545_s5 + $0x30] sm:$0xff]  ;;  %v912_v45 = vmul.f32 %v2079_v41, %v908_v36 }
 0x27f   : > { %v1204_v31 = vmul.f32 %v1189_v15, %v2364_v27  ;;  %1979 = vmatprep.subr.bf16.mxu0 %v1978_v23  ;;  %v1958_v27 = vpack.c.bf16 %v300_v21, %v299_v20  ;;  %v1962_v34 = vpack.c.bf16 %v302_v33, %v301_v29  ;;  %v915_v46 = vsub.f32 2.0, %v913_v43 }
 0x280   : > { %1981 = vmatpush3.bf16.msra.mxu0 %v1978_v23  ;;  %v914_v25 = vsub.f32 2.0, %v912_v45 }
 0x281   : > { %v1982_v14 = vpack.c.bf16 %v1205_v26, %v1204_v31  ;;  %1959 = vmatprep.subr.bf16.mxu1 %v1958_v27  ;;  %v917_v52 = vmul.f32 %v2077_v39, %v915_v46 }
 0x282   : > { %1961 = vmatpush3.bf16.msra.mxu1 %v1958_v27  ;;  %v916_v54 = vmul.f32 %v2079_v41, %v914_v25 }
 0x283   : > { %1983 = vmatprep.subr.bf16.mxu0 %v1982_v14  ;;  %1963 = vmatprep.subr.bf16.mxu1 %v1962_v34 }
 0x284   : > { %1985 = vmatpush3.bf16.msra.mxu0 %v1982_v14 }
 0x285   : > { %2003 = vmatprep.subr.bf16.mxu0 %v1950_v59 }
 0x286   : > { %1965 = vmatpush3.bf16.msra.mxu1 %v1962_v34 }
 0x287   : > { %1858 = vmatmul.mubr.msk.f32.vlgmr.msra.gmra.mrb[18].mxu0 %vm525_vm1, %v2283_v28  ;;  %1987 = vmatprep.subr.bf16.mxu1 %v2312_v1 }
 0x288   : > { %2005 = vmatpush3.bf16.msra.mxu0 %v1950_v59 }
 0x289   : > { %2007 = vmatprep.subr.bf16.mxu0 %v1954_v5 }
 0x28c   : > { %2009 = vmatpush3.bf16.msra.mxu0 %v1954_v5 }
 0x28d   : > { %2011 = vmatprep.subr.bf16.mxu0 %v1958_v27 }
 0x290   : > { %2013 = vmatpush3.bf16.msra.mxu0 %v1958_v27  ;;  %s2029_s19 = spop %2028 }
 0x291   : > { %2015 = vmatprep.subr.bf16.mxu0 %v1962_v34 }
 0x294   : > { %2017 = vmatpush3.bf16.msra.mxu0 %v1962_v34 }
 0x346   : > { %v1786_v48 = vpop.f32.mrb[8].mxu1 }
 0x347   : > { %v820_v49 = vmul.f32 %v1786_v48, %v2423_v55  ;;  %v809_v50 = vpop.f32.mrb[9].mxu1 }
 0x348   : > { %v819_v51 = vmul.f32 %v2423_v55, %v809_v50 }
 0x349   : > { %v822_v53 = vadd.f32 %v820_v49, %v2385_v42 }
 0x34a   : > { %v821_v56 = vadd.f32 %v819_v51, %v2385_v42 }
 0x34b   : > { %v919_v58 = vmul.f32 %v917_v52, %v822_v53 }
 0x34c   : > { %v918_v59 = vmul.f32 %v916_v54, %v821_v56 }
 0x34e   : > { %1822 = vmatprep.mubr.msk.f32.mxu1 %vm525_vm1, %v918_v59 }
 0x34f   : > { %1823 = vmatmul.mubr.msk.f32.vlgmr.msra.gmra.mrb[10].mxu1 %vm525_vm1, %v919_v58 }
 0x350   : > { %1989 = vmatpush3.bf16.msra.mxu1 %v2312_v1  ;;  %1876 = vmatprep.mubr.msk.f32.mxu1 %vm525_vm1, %v1301_v60 }
 0x351   : > { %1991 = vmatprep.subr.bf16.mxu1 %v2342_v16 }
 0x354   : > { %1993 = vmatpush3.bf16.msra.mxu1 %v2342_v16 }
 0x355   : > { %1995 = vmatprep.subr.bf16.mxu1 %v2359_v22 }
 0x358   : > { %1997 = vmatpush3.bf16.msra.mxu1 %v2359_v22  ;;  %v1296_v22 = vstv %s2029_s19 }
 0x359   : > { %1999 = vmatprep.subr.bf16.mxu1 %v2376_v32 }
 0x35a   : > { %v1859_v42 = vpop.f32.mrb[18].mxu0 }
 0x35b   : > { %v1287_v55 = vpop.f32.mrb[19].mxu0  ;;  %v1298_v6 = vmul.f32 %v1859_v42, %v1296_v22 }
 0x35c   : > { %2001 = vmatpush3.bf16.msra.mxu1 %v2376_v32  ;;  %v1297_v8 = vmul.f32 %v1296_v22, %v1287_v55 }
 0x35d   : > { %v1300_v12 = vadd.f32 %v1298_v6, %v1214_v57 }
 0x35e   : > { %v1299_v17 = vadd.f32 %v1297_v8, %v1214_v57 }
 0x35f   : > { %1877 = vmatmul.mubr.msk.f32.vlgmr.msra.gmra.mrb[12].mxu1 %vm525_vm1, %v1302_v30 }
 0x422   : > { %v1824_v1 = vpop.f32.mrb[10].mxu1 }
 0x423   : > { %1002 = vst [vmem:[%s2480_s18 + $0x8] sm:$0xff] %v1824_v1  ;;  %v992_v16 = vpop.f32.mrb[11].mxu1 }
 0x424   : > { %1001 = vst [vmem:[%s2480_s18] sm:$0xff] %v992_v16 }
 0x432   : > { %v1878_v61 = vpop.f32.mrb[12].mxu1 }
 0x433   : > { %v1385_v62 = vmul.f32 %v1878_v61, %v1296_v22  ;;  %v1375_v32 = vpop.f32.mrb[13].mxu1 }
 0x434   : > { %v1384_v2 = vmul.f32 %v1375_v32, %v1296_v22 }
 0x435   : > { %v1387_v28 = vadd.f32 16.0, %v1385_v62 }
 0x436   : > { %v1386_v3 = vadd.f32 16.0, %v1384_v2 }
 0x437   : > { %2080 = vrcp.f32 %v1387_v28 }
 0x438   : > { %2082 = vrcp.f32 %v1386_v3 }
 0x441   : > { %v2081_v4 = vpop.eup %2080 }
 0x442   : > { %v2083_v5 = vpop.eup %2082  ;;  %v1391_v7 = vmul.f32 %v2081_v4, %v1387_v28 }
 0x443   : > { %v1390_v9 = vmul.f32 %v2083_v5, %v1386_v3 }
 0x444   : > { %v1393_v10 = vsub.f32 2.0, %v1391_v7 }
 0x445   : > { %v1392_v11 = vsub.f32 2.0, %v1390_v9 }
 0x446   : > { %v1395_v13 = vmul.f32 %v2081_v4, %v1393_v10 }
 0x447   : > { %v1394_v0 = vmul.f32 %v2083_v5, %v1392_v11 }
 0x448   : > { %v1397_v18 = vmul.f32 %v1395_v13, %v1300_v12 }
 0x449   : > { %v1396_v63 = vmul.f32 %v1394_v0, %v1299_v17 }
 0x44b   : > { %1895 = vmatprep.mubr.msk.f32.mxu0 %vm525_vm1, %v1396_v63 }
 0x44c   : > { %1896 = vmatmul.mubr.msk.f32.vlgmr.msra.gmra.mrb[20].mxu0 %vm525_vm1, %v1397_v18 }
 0x51f   : > { %v1897_v19 = vpop.f32.mrb[20].mxu0 }
 0x520   : > { %1480 = vst [vmem:[%s2480_s18 + $0x18] sm:$0xff] %v1897_v19  ;;  %v1470_v23 = vpop.f32.mrb[21].mxu0 }
 0x521   : > { %1479 = vst [vmem:[%s2480_s18 + $0x10] sm:$0xff] %v1470_v23 }
 0x522   : > { %2097 = shalt.err (!%p2094_p3)
}
 0x523   : > { %s2098_s14 = scalar_lea.hbm %s2493_s9, 512  ;;  %s2102_s17 = scalar_lea.hbm %s2546_s6, 1024 }
 0x524   : > { %p2099_p4 = scmp.ne.s32.totalorder %s2493_s9, %s2098_s14  ;;  %p2103_p9 = scmp.lt.u32.totalorder %s2493_s9, %s2546_s6 }
 0x525   : > { %p2104_p10 = scmp.lt.u32.totalorder %s2102_s17, %s2098_s14  ;;  %p2106_p12 = scmp.lt.u32.totalorder %s2098_s14, %s2493_s9 }
 0x526   : > { %p2100_p7 = pnand %p2099_p4, %p2225_p5 }
 0x527   : > { %p2105_p11 = por %p2104_p10, %p2103_p9 }
 0x528   : > { %p2101_p8 = pneg %p2100_p7 }
 0x529   : > { %p2107_p13 = por %p2106_p12, %p2105_p11 }
 0x52b   : > { %p2108_p0 = pnand %p2107_p13, %p2101_p8 }
 0x52d   : > { %2111 = shalt.err (!%p2108_p0)
}
 0x52e   : > { %s2150_s26 = smov 128   ;;  %s2151_s28 = smov 8  }
 0x52f   : > { %2030 = dma.vmem_to_hbm [thread:$0]  (%p2225_p5), %s2488_s20, 512, %s2493_s9, %s2499_s10, %s2150_s26, %s2150_s26, %s2151_s28  }
 0x530 PF: > { %p2036_p1 = scmp.ge.s32.totalorder %s2146_s24, 2  ;;  %s1510_s29 = sand.u32 1, %s2134_s21  }
 0x531   : > { %s1511_s11 = scalar_lea.sflag [#allocation3], %s1510_s29 }
 0x532   : > { %p2033_p2 = pnand %p2036_p1, %p2229_p6 }
 0x534   : > { %2129 = dma.done.wait (!%p2033_p2), %s1511_s11, 512  }
 0x535   : > { %2131 = vsyncadd (!%p2033_p2), %s1511_s11, 4294966784  ;;  %p16_p3 = scmp.ge.s32.totalorder %s2212_s27, 4   ;;  %s2549_s21 = smov %s2138_s22 }
 0x536   : > { %s2550_s22 = smov %s2142_s23  ;;  %s2551_s23 = smov %s2223_s30 }
 0x537   : > { %s2552_s24 = smov %s2212_s27  ;;  %18 = sbr.rel (!%p16_p3) target bundleno = 3 (0x3), region = 84 }
 0x53e   :  { %1516 = vsyncpa [#allocation3], 1 }
 0x53f   :  { %1518 = vsyncpa [#allocation3 + $0x1], 1 }

</bundles_post_ra>
